<compile_context>
chip_gen: v7x
topology: tpu7x:2x2x1
jax: 0.10.0
libtpu: 0.0.40
codegen_flags: <defaults>
</compile_context>

<pallas_src>
import jax
import jax.numpy as jnp
from jax.experimental import pallas as pl
from jax.experimental.pallas import tpu as pltpu

LANE = 128  # TPU lane width; final feature dim padded to this for dense stores.


def mlp_kernel(x_ref, w1_ref, b1_ref, w2_ref, b2_ref, w3_ref, b3_ref, o_ref):
    """Fused fc1+ReLU -> fc2+ReLU -> fc3 on one (TB, in_dim) batch tile."""
    x = x_ref[...]

    h1 = jnp.dot(x, w1_ref[...], preferred_element_type=jnp.float32) + b1_ref[...]
    h1 = jnp.maximum(h1, 0.0)

    h2 = jnp.dot(h1, w2_ref[...], preferred_element_type=jnp.float32) + b2_ref[...]
    h2 = jnp.maximum(h2, 0.0)

    # w3/b3 arrive zero-padded to 128 output lanes -> lane-dense store.
    h3 = jnp.dot(h2, w3_ref[...], preferred_element_type=jnp.float32) + b3_ref[...]

    o_ref[...] = h3.astype(o_ref.dtype)


def mlp_forward(x, w1, b1, w2, b2, w3, b3, *, batch_tile=1024):
    B, in_dim = x.shape
    out_dim = w3.shape[1]

    # Pad the 3-wide final layer to 128 lanes (zeros) so stores are unmasked.
    w3p = jnp.zeros((w3.shape[0], LANE), w3.dtype).at[:, :out_dim].set(w3)
    b3p = jnp.zeros((1, LANE), b3.dtype).at[:, :out_dim].set(b3)

    # Batch tile: large tiles amortize the ~0.35us per-grid-step overhead;
    # small batches use a single tile rounded up to a multiple of 8 sublanes.
    if B >= batch_tile:
        tb = batch_tile
    else:
        tb = max(8, -(-B // 8) * 8)
    b_pad = pl.cdiv(B, tb) * tb
    if b_pad != B:
        x = jnp.pad(x, ((0, b_pad - B), (0, 0)))

    grid = (b_pad // tb,)

    # Weights/biases: full-array blocks, grid-invariant index map -> resident
    # in VMEM across all grid steps (never re-DMA'd).
    def resident(a):
        return pl.BlockSpec(a.shape, lambda i: (0,) * a.ndim)

    out = pl.pallas_call(
        mlp_kernel,
        out_shape=jax.ShapeDtypeStruct((b_pad, LANE), jnp.float32),
        grid_spec=pltpu.PrefetchScalarGridSpec(
            num_scalar_prefetch=0,
            grid=grid,
            in_specs=[
                pl.BlockSpec((tb, in_dim), lambda i: (i, 0)),  # x: tiled over batch
                resident(w1), resident(b1),
                resident(w2), resident(b2),
                resident(w3p), resident(b3p),
            ],
            out_specs=pl.BlockSpec((tb, LANE), lambda i: (i, 0)),
        ),
        compiler_params=pltpu.CompilerParams(
            # Batch axis is embarrassingly parallel -> megacore-shard on v7x.
            dimension_semantics=("parallel",),
            # Explicit, conservative: even tb=4096 double-buffered tiles are a
            # few MiB, well under v7x's 64 MiB physical / 32 MiB scoped VMEM
            # and v5e's 16 MiB scoped default.
            vmem_limit_bytes=32 * 1024 * 1024,
        ),
    )(x, w1, b1, w2, b2, w3p, b3p)

    return out[:B, :out_dim]


def init_linear(key, fan_in, fan_out):
    """Deterministic init mimicking PyTorch nn.Linear default (+/- 1/sqrt(fan_in))."""
    kw, kb = jax.random.split(key)
    bound = 1.0 / jnp.sqrt(fan_in)
    w = jax.random.uniform(kw, (fan_in, fan_out), jnp.float32, -bound, bound)  # (in, out)
    b = jax.random.uniform(kb, (1, fan_out), jnp.float32, -bound, bound)
    return w, b


def reference(x, w1, b1, w2, b2, w3, b3):
    h = jnp.maximum(x @ w1 + b1, 0.0)
    h = jnp.maximum(h @ w2 + b2, 0.0)
    return h @ w3 + b3


if __name__ == "__main__":
    key = jax.random.PRNGKey(0)
    k_x1, k_x2, k1, k2, k3 = jax.random.split(key, 5)

    w1, b1 = init_linear(k1, 4, 10)
    w2, b2 = init_linear(k2, 10, 8)
    w3, b3 = init_linear(k3, 8, 3)

    # Small-batch check (matches the scale implied by the PyTorch module).
    x_small = jax.random.normal(k_x1, (8, 4), jnp.float32)
    out_small = jax.block_until_ready(mlp_forward(x_small, w1, b1, w2, b2, w3, b3))
    ref_small = reference(x_small, w1, b1, w2, b2, w3, b3)
    assert out_small.shape == (8, 3)
    assert jnp.allclose(out_small, ref_small, atol=1e-5), "small-batch mismatch"

    # Larger, non-multiple batch exercises the multi-tile grid + padding path.
    x_big = jax.random.normal(k_x2, (2061, 4), jnp.float32)
    out_big = jax.block_until_ready(mlp_forward(x_big, w1, b1, w2, b2, w3, b3))
    ref_big = reference(x_big, w1, b1, w2, b2, w3, b3)
    assert out_big.shape == (2061, 3)
    assert jnp.allclose(out_big, ref_big, atol=1e-5), "large-batch mismatch"

    print("KERNEL_OK")
</pallas_src>

<mosaic_0001>
module attributes {stable_mosaic.version = 11 : i64} {
  func.func @mlp_kernel(%arg0: i32, %arg1: memref<8x4xf32, #tpu.memory_space<vmem>>, %arg2: memref<4x10xf32, #tpu.memory_space<vmem>>, %arg3: memref<1x10xf32, #tpu.memory_space<vmem>>, %arg4: memref<10x8xf32, #tpu.memory_space<vmem>>, %arg5: memref<1x8xf32, #tpu.memory_space<vmem>>, %arg6: memref<8x128xf32, #tpu.memory_space<vmem>>, %arg7: memref<1x128xf32, #tpu.memory_space<vmem>>, %arg8: memref<8x128xf32, #tpu.memory_space<vmem>>) attributes {dimension_semantics = [#tpu.dimension_semantics<parallel>], iteration_bounds = array<i64: 1>, scalar_prefetch = 0 : i64, scratch_operands = 0 : i64, tpu.core_type = #tpu.core_type<tc>, window_params = [{transform_indices = @transform_0, window_bounds = array<i64: 8, 4>}, {pipeline_mode = #tpu.pipeline_mode<synchronous>, transform_indices = @transform_1, window_bounds = array<i64: 4, 10>}, {pipeline_mode = #tpu.pipeline_mode<synchronous>, transform_indices = @transform_2, window_bounds = array<i64: 1, 10>}, {pipeline_mode = #tpu.pipeline_mode<synchronous>, transform_indices = @transform_3, window_bounds = array<i64: 10, 8>}, {pipeline_mode = #tpu.pipeline_mode<synchronous>, transform_indices = @transform_4, window_bounds = array<i64: 1, 8>}, {pipeline_mode = #tpu.pipeline_mode<synchronous>, transform_indices = @transform_5, window_bounds = array<i64: 8, 128>}, {pipeline_mode = #tpu.pipeline_mode<synchronous>, transform_indices = @transform_6, window_bounds = array<i64: 1, 128>}, {transform_indices = @transform_7, window_bounds = array<i64: 8, 128>}]} {
    %c0 = arith.constant 0 : index
    %c0_0 = arith.constant 0 : index
    %0 = vector.load %arg1[%c0, %c0_0] : memref<8x4xf32, #tpu.memory_space<vmem>>, vector<8x4xf32>
    %c0_1 = arith.constant 0 : index
    %c0_2 = arith.constant 0 : index
    %1 = vector.load %arg2[%c0_1, %c0_2] : memref<4x10xf32, #tpu.memory_space<vmem>>, vector<4x10xf32>
    %cst = arith.constant dense<0.000000e+00> : vector<8x10xf32>
    %2 = tpu.matmul %0, %1, %cst {dimension_numbers = #tpu.dot_dimension_numbers<[1], [0], [0], [1], [0, 0, 1, 1], [], []>} : vector<8x4xf32>, vector<4x10xf32>, vector<8x10xf32> -> vector<8x10xf32>
    %c0_3 = arith.constant 0 : index
    %c0_4 = arith.constant 0 : index
    %3 = vector.load %arg3[%c0_3, %c0_4] : memref<1x10xf32, #tpu.memory_space<vmem>>, vector<1x10xf32>
    %4 = vector.broadcast %3 : vector<1x10xf32> to vector<8x10xf32>
    %5 = arith.addf %2, %4 : vector<8x10xf32>
    %cst_5 = arith.constant 0.000000e+00 : f32
    %6 = vector.broadcast %cst_5 : f32 to vector<8x10xf32>
    %7 = arith.maximumf %5, %6 : vector<8x10xf32>
    %c0_6 = arith.constant 0 : index
    %c0_7 = arith.constant 0 : index
    %8 = vector.load %arg4[%c0_6, %c0_7] : memref<10x8xf32, #tpu.memory_space<vmem>>, vector<10x8xf32>
    %cst_8 = arith.constant dense<0.000000e+00> : vector<8x8xf32>
    %9 = tpu.matmul %7, %8, %cst_8 {dimension_numbers = #tpu.dot_dimension_numbers<[1], [0], [0], [1], [0, 0, 1, 1], [], []>} : vector<8x10xf32>, vector<10x8xf32>, vector<8x8xf32> -> vector<8x8xf32>
    %c0_9 = arith.constant 0 : index
    %c0_10 = arith.constant 0 : index
    %10 = vector.load %arg5[%c0_9, %c0_10] : memref<1x8xf32, #tpu.memory_space<vmem>>, vector<1x8xf32>
    %11 = vector.broadcast %10 : vector<1x8xf32> to vector<8x8xf32>
    %12 = arith.addf %9, %11 : vector<8x8xf32>
    %cst_11 = arith.constant 0.000000e+00 : f32
    %13 = vector.broadcast %cst_11 : f32 to vector<8x8xf32>
    %14 = arith.maximumf %12, %13 : vector<8x8xf32>
    %c0_12 = arith.constant 0 : index
    %c0_13 = arith.constant 0 : index
    %15 = vector.load %arg6[%c0_12, %c0_13] : memref<8x128xf32, #tpu.memory_space<vmem>>, vector<8x128xf32>
    %cst_14 = arith.constant dense<0.000000e+00> : vector<8x128xf32>
    %16 = tpu.matmul %14, %15, %cst_14 {dimension_numbers = #tpu.dot_dimension_numbers<[1], [0], [0], [1], [0, 0, 1, 1], [], []>} : vector<8x8xf32>, vector<8x128xf32>, vector<8x128xf32> -> vector<8x128xf32>
    %c0_15 = arith.constant 0 : index
    %c0_16 = arith.constant 0 : index
    %17 = vector.load %arg7[%c0_15, %c0_16] : memref<1x128xf32, #tpu.memory_space<vmem>>, vector<1x128xf32>
    %18 = vector.broadcast %17 : vector<1x128xf32> to vector<8x128xf32>
    %19 = arith.addf %16, %18 : vector<8x128xf32>
    %c0_17 = arith.constant 0 : index
    %c0_18 = arith.constant 0 : index
    %20 = vector.load %arg8[%c0_17, %c0_18] : memref<8x128xf32, #tpu.memory_space<vmem>>, vector<8x128xf32>
    tpu.vector_store %arg8[%c0_17, %c0_18], %19 {strides = array<i32>} : memref<8x128xf32, #tpu.memory_space<vmem>>, vector<8x128xf32>,
    return
  }
  func.func @transform_0(%arg0: i32) -> (i32, i32) {
    %c0_i32 = arith.constant 0 : i32
    %c0_i32_0 = arith.constant 0 : i32
    return %arg0, %c0_i32 : i32, i32
  }
  func.func @transform_1(%arg0: i32) -> (i32, i32) {
    %c0_i32 = arith.constant 0 : i32
    %c0_i32_0 = arith.constant 0 : i32
    %c0_i32_1 = arith.constant 0 : i32
    return %c0_i32, %c0_i32_0 : i32, i32
  }
  func.func @transform_2(%arg0: i32) -> (i32, i32) {
    %c0_i32 = arith.constant 0 : i32
    %c0_i32_0 = arith.constant 0 : i32
    %c0_i32_1 = arith.constant 0 : i32
    return %c0_i32, %c0_i32_0 : i32, i32
  }
  func.func @transform_3(%arg0: i32) -> (i32, i32) {
    %c0_i32 = arith.constant 0 : i32
    %c0_i32_0 = arith.constant 0 : i32
    %c0_i32_1 = arith.constant 0 : i32
    return %c0_i32, %c0_i32_0 : i32, i32
  }
  func.func @transform_4(%arg0: i32) -> (i32, i32) {
    %c0_i32 = arith.constant 0 : i32
    %c0_i32_0 = arith.constant 0 : i32
    %c0_i32_1 = arith.constant 0 : i32
    return %c0_i32, %c0_i32_0 : i32, i32
  }
  func.func @transform_5(%arg0: i32) -> (i32, i32) {
    %c0_i32 = arith.constant 0 : i32
    %c0_i32_0 = arith.constant 0 : i32
    %c0_i32_1 = arith.constant 0 : i32
    return %c0_i32, %c0_i32_0 : i32, i32
  }
  func.func @transform_6(%arg0: i32) -> (i32, i32) {
    %c0_i32 = arith.constant 0 : i32
    %c0_i32_0 = arith.constant 0 : i32
    %c0_i32_1 = arith.constant 0 : i32
    return %c0_i32, %c0_i32_0 : i32, i32
  }
  func.func @transform_7(%arg0: i32) -> (i32, i32) {
    %c0_i32 = arith.constant 0 : i32
    %c0_i32_0 = arith.constant 0 : i32
    return %arg0, %c0_i32 : i32, i32
  }
}

</mosaic_0001>

<bundles_post_ra>
// kernel: tpu_custom_call.1
= control target key start
LH: loop header
LB: loop body
LE: loop exit
PB: predicated region body
PF: predicated region fallthrough
CT: control target
= control target key end

     0   :  { %vm40_vm0 = vcmask 1043456   ;;  %v365_v2 = vmov 0.0   ;;  %vm366_vm1 = vmmov 0   ;;  %vm36_vm2 = vcmask 31744   ;;  %s446_s0 = inlined_call_operand.vmem [shape: f32[8,4], index: 0, kind: input, shape index: {}]   ;;  %s447_s1 = inlined_call_operand.vmem [shape: f32[4,10], index: 1, kind: input, shape index: {}]   ;;  %s448_s2 = inlined_call_operand.vmem [shape: f32[1,10], index: 2, kind: input, shape index: {}]   ;;  %s449_s3 = inlined_call_operand.vmem [shape: f32[10,8], index: 3, kind: input, shape index: {}]   ;;  %s450_s4 = inlined_call_operand.vmem [shape: f32[1,8], index: 4, kind: input, shape index: {}]   ;;  %s451_s5 = inlined_call_operand.vmem [shape: f32[8,128], index: 5, kind: input, shape index: {}]   ;;  %s452_s6 = inlined_call_operand.vmem [shape: f32[1,128], index: 6, kind: input, shape index: {}]   ;;  %s453_s7 = inlined_call_operand.hbm [shape: f32[8,128], index: 7, kind: output, shape index: {}]  }
   0x1   :  { %v28_v0 = vld [vmem:[%s447_s1] sm:$0xf]  ;;  %315 = vmatprep.subr.mxu0 %v365_v2  ;;  %317 = vmatprep.mubr.msk.f32.mxu0 %vm366_vm1, %v365_v2 }
   0x2   :  { %v27_v1 = vld [vmem:[%s446_s0] sm:$0xff] }
   0x3   :  { %12 = vsyncpa [#allocation3], 0  ;;  %316 = vmatpush3.msk.msra.mxu0 %vm40_vm0, %v28_v0  ;;  %324 = vmatprep.mubr.msk.f32.mxu1 %vm366_vm1, %v365_v2  ;;  %v115_v3 = vld [vmem:[%s449_s3] sm:$0xff]  ;;  %v116_v4 = vld [vmem:[%s449_s3 + $0x8] sm:$0x3]  ;;  %vm128_vm3 = vcmask 1041408  }
   0x4   :  { %318 = vmatmul.mubr.msk.f32.vlgmr.msra.gmra.mrb[0].mxu0 %vm36_vm2, %v27_v1  ;;  %327 = vmatprep.subr.mxu0 %v365_v2  ;;  %v333_v5 = vpack.c.bf16 %v116_v4, %v115_v3  ;;  %v367_v6 = vmov 0.0|0.0   ;;  %vm368_vm4 = vmmov 1   ;;  %v300_v7 = vld [vmem:[%s448_s2] ss:$0 sm:$0xff]  ;;  %vm124_vm6 = vcmask 80896   ;;  %s369_s13 = smov [#allocation2]  }
   0x5   :  { %329 = vmatprep.mubr.msk.f32.mxu0 %vm366_vm1, %v365_v2  ;;  %332 = vmatprep.subr.bf16.mxu1 %v367_v6  ;;  %vm334_vm5 = vmpackc.low %vm128_vm3, %vm368_vm4  ;;  %v203_v12 = vld [vmem:[%s451_s5] sm:$0xff]  ;;  %vm211_vm7 = vcmask 64512   ;;  %s292_s14 = sshll.u32 %s369_s13, 4  ;;  %s293_s14 = int_to_ptr.vmem [resolvable:$true] %s292_s14 }
   0x6   :  { %335 = vmatpush3.bf16.msk.msra.mxu1 %vm334_vm5, %v333_v5  ;;  %328 = vmatpush3.msra.mxu0 %v203_v12  ;;  %v303_v13 = vld [vmem:[%s450_s4] ss:$0 sm:$0xff]  ;;  %s341_s5 = scalar_lea.vmem %s293_s14, 128  ;;  %p346_p1 = scmp.lt.s32.totalorder %s293_s14, %s293_s14 }
   0x7   :  { %v306_v18 = vld [vmem:[%s452_s6] ss:$0 sm:$0xff]  ;;  %p342_p0 = scmp.ne.s32.totalorder %s293_s14, %s341_s5  ;;  %p347_p2 = scmp.lt.s32.totalorder %s341_s5, %s341_s5 }
   0x9   :  { %p348_p3 = por %p347_p2, %p346_p1 }
   0xb   :  { %p349_p4 = pnand %p348_p3, %p342_p0 }
  0xd7   :  { %v110_v8 = vpop.f32.mrb[0].mxu0 }
  0xd8   :  { %v111_v9 = vadd.f32 %v300_v7, %v110_v8  ;;  %v319_v10 = vpop.f32.mrb[1].mxu0 }
  0xda   :  { %v114_v11 = vmax.f32 %v111_v9, 0.0 }
  0xdc   :  { %325 = vmatmul.mubr.msk.f32.vlgmr.msra.gmra.mrb[0].mxu1 %vm124_vm6, %v114_v11 }
 0x1af   :  { %v198_v14 = vpop.f32.mrb[0].mxu1 }
 0x1b0   :  { %v199_v15 = vadd.f32 %v303_v13, %v198_v14  ;;  %v326_v16 = vpop.f32.mrb[1].mxu1 }
 0x1b2   :  { %v202_v17 = vmax.f32 %v199_v15, 0.0 }
 0x1b4   :  { %330 = vmatmul.mubr.msk.f32.vlgmr.msra.gmra.mrb[2].mxu0 %vm211_vm7, %v202_v17 }
 0x287   :  { %v281_v19 = vpop.f32.mrb[2].mxu0 }
 0x288   :  { %v282_v20 = vadd.f32 %v306_v18, %v281_v19  ;;  %v331_v21 = vpop.f32.mrb[3].mxu0 }
 0x28a   :  { %285 = vst [vmem:[#allocation2] sm:$0xff] %v282_v20 }
 0x28b   :  { %352 = shalt.err (!%p349_p4)
}
 0x28c   :  { %s353_s16 = scalar_lea.hbm %s453_s7, 128 }
 0x28d   :  { %p354_p5 = scmp.ne.s32.totalorder %s453_s7, %s353_s16  ;;  %p357_p6 = scmp.lt.u32.totalorder %s353_s16, %s453_s7 }
 0x28f   :  { %p359_p7 = pnand %p357_p6, %p354_p5 }
 0x291   :  { %362 = shalt.err (!%p359_p7)
}
 0x292   :  { %295 = dma.vmem_to_hbm [thread:$0]  %s293_s14, 128, %s453_s7, [#allocation3]  }
 0x293   :  { %363 = dma.done.wait [#allocation3], 128  }
 0x294   :  { %364 = vsyncadd [#allocation3], 4294967168 }
 0x295   :  { %299 = vsyncpa [#allocation3], 1 }

</bundles_post_ra>
